<compile_context>
chip_gen: v5e
topology: v5e:2x2
jax: 0.10.0
libtpu: 0.0.40
codegen_flags: <defaults>
</compile_context>

<pallas_src>
import jax
import jax.numpy as jnp
from jax.experimental import pallas as pl
from jax.experimental.pallas import tpu as pltpu

LANE = 128  # vreg lane width


def _round_up(n, m):
    return ((n + m - 1) // m) * m


def _pad2(a, shape):
    """Zero-pad a 2-D array up to `shape` (bottom/right padding)."""
    pr = shape[0] - a.shape[0]
    pc = shape[1] - a.shape[1]
    if pr == 0 and pc == 0:
        return a
    return jnp.pad(a, ((0, pr), (0, pc)))


def mlp_kernel(x_ref, w1_ref, b1_ref, w2_ref, b2_ref, w3_ref, b3_ref, o_ref):
    f32 = jnp.float32
    cdt = w1_ref.dtype  # compute dtype (bf16 by default)

    # Per-tile cast of the activation (avoids a separate wrapper cast pass).
    x = x_ref[...].astype(cdt)

    # l1 + LeakyReLU (negative_slope = 0.01, PyTorch default).
    # bf16 x bf16 on the MXU, f32 accumulation; epilogue in f32.
    h = jnp.dot(x, w1_ref[...], preferred_element_type=f32) + b1_ref[...]
    h = jnp.maximum(h, 0.01 * h)

    # l2 + Tanh (tanh goes to the EUP; kept in f32 — v5e has no bf16 EUP).
    h = jnp.dot(h.astype(cdt), w2_ref[...], preferred_element_type=f32) + b2_ref[...]
    h = jnp.tanh(h)

    # l3 (no activation)
    out = jnp.dot(h.astype(cdt), w3_ref[...], preferred_element_type=f32) + b3_ref[...]
    o_ref[...] = out.astype(o_ref.dtype)


def prepare_params(params, *, compute_dtype=jnp.bfloat16):
    """Pad (lane-align) and cast the weights ONCE.  Reuse across forwards."""
    w1, b1, w2, b2, w3, b3 = params
    in_dim, hid = w1.shape
    out_dim = w3.shape[1]

    in_p = _round_up(in_dim, LANE)
    hid_p = _round_up(hid, LANE)
    out_p = _round_up(out_dim, LANE)

    w1_p = _pad2(w1, (in_p, hid_p)).astype(compute_dtype)
    w2_p = _pad2(w2, (hid_p, hid_p)).astype(compute_dtype)
    w3_p = _pad2(w3, (hid_p, out_p)).astype(compute_dtype)
    # Biases stay f32: they are added to the f32 accumulator.
    b1_p = _pad2(b1, (1, hid_p))
    b2_p = _pad2(b2, (1, hid_p))
    b3_p = _pad2(b3, (1, out_p))

    return {
        "weights": (w1_p, b1_p, w2_p, b2_p, w3_p, b3_p),
        "dims": (in_dim, hid, out_dim),
        "padded_dims": (in_p, hid_p, out_p),
        "compute_dtype": compute_dtype,
    }


def neural_net_forward(x, prepared, *, batch_tile=None):
    """Fused MLP forward. x: [B, input_size] f32. Returns [B, output_size] f32."""
    w1_p, b1_p, w2_p, b2_p, w3_p, b3_p = prepared["weights"]
    in_dim, hid, out_dim = prepared["dims"]
    in_p, hid_p, out_p = prepared["padded_dims"]
    compute_dtype = prepared["compute_dtype"]

    B = x.shape[0]
    assert x.shape[1] == in_dim

    # Sublane rounding is dtype-dependent: bf16 packs 16 rows per vreg group.
    sublane = 16 if jnp.dtype(compute_dtype).itemsize == 2 else 8

    # --- batch tiling --------------------------------------------------------
    # Small B: one minimal tile (keep padded-row waste minimal).
    # B >= 512: >=2 grid steps in 256-row multiples so the two TensorCores of
    # a v7x chip both get work via dimension_semantics=("parallel",).
    if batch_tile is None:
        if B < 512:
            batch_tile = max(sublane, _round_up(B, sublane))
        else:
            batch_tile = 256 if B <= 1024 else 512
    batch_tile = _round_up(batch_tile, sublane)
    B_p = _round_up(B, batch_tile)

    # --- pad x only if needed (cast to bf16 happens per-tile in the kernel) --
    if B_p == B and in_p == in_dim:
        x_p = x
    else:
        x_p = _pad2(x, (B_p, in_p))

    grid = (B_p // batch_tile,)

    # --- VMEM budget (weights single-buffered, x/out tiles double-buffered) --
    cbytes = jnp.dtype(compute_dtype).itemsize
    x_bytes = 2 * batch_tile * in_p * x_p.dtype.itemsize          # 2 buffers
    out_bytes = 2 * batch_tile * out_p * 4                        # 2 buffers
    w_bytes = (in_p * hid_p + hid_p * hid_p + hid_p * out_p) * cbytes  # Buffered(1)
    b_bytes = (2 * hid_p + out_p) * 4
    interm_bytes = 3 * batch_tile * hid_p * 4                     # live f32 h tiles
    vmem_budget = int(1.5 * (x_bytes + out_bytes + w_bytes + b_bytes + interm_bytes))
    vmem_limit = min(max(vmem_budget, 4 << 20), 64 << 20)         # cap at v7x physical

    # --- advisory cost estimate for the XLA scheduler ------------------------
    flops = 2 * B_p * (in_p * hid_p + hid_p * hid_p + hid_p * out_p)
    transcendentals = B_p * hid_p  # tanh
    bytes_accessed = (
        x_p.size * x_p.dtype.itemsize
        + sum(a.size * a.dtype.itemsize
              for a in (w1_p, b1_p, w2_p, b2_p, w3_p, b3_p))
        + B_p * out_p * 4
    )
    cost = pl.CostEstimate(flops=flops,
                           transcendentals=transcendentals,
                           bytes_accessed=bytes_accessed)

    def xmap(i):
        return (i, 0)

    def wmap(i):
        return (0, 0)

    def wspec(shape):
        # Grid-invariant block: single-buffer it (halves weight VMEM footprint).
        return pl.BlockSpec(shape, wmap, pipeline_mode=pl.Buffered(1))

    out_padded = pl.pallas_call(
        mlp_kernel,
        out_shape=jax.ShapeDtypeStruct((B_p, out_p), jnp.float32),
        grid_spec=pltpu.PrefetchScalarGridSpec(
            num_scalar_prefetch=0,
            grid=grid,
            in_specs=[
                pl.BlockSpec((batch_tile, in_p), xmap),   # x (f32, cast in-kernel)
                wspec((in_p, hid_p)),                     # w1
                wspec((1, hid_p)),                        # b1
                wspec((hid_p, hid_p)),                    # w2
                wspec((1, hid_p)),                        # b2
                wspec((hid_p, out_p)),                    # w3
                wspec((1, out_p)),                        # b3
            ],
            out_specs=pl.BlockSpec((batch_tile, out_p), xmap),
        ),
        compiler_params=pltpu.CompilerParams(
            dimension_semantics=("parallel",),
            vmem_limit_bytes=vmem_limit,
        ),
        cost_estimate=cost,
    )(x_p, w1_p, b1_p, w2_p, b2_p, w3_p, b3_p)

    # Slice off lane / batch padding (no-op copy when nothing was padded).
    if B_p == B and out_p == out_dim:
        return out_padded
    return out_padded[:B, :out_dim]


def init_params(key, input_size, hidden_size, output_size):
    """Deterministic init mimicking nn.Linear's U(-1/sqrt(fan_in), 1/sqrt(fan_in))."""
    ks = jax.random.split(key, 6)

    def linear(kw, kb, fan_in, fan_out):
        bound = 1.0 / jnp.sqrt(fan_in)
        # stored as [in, out] so the kernel does x @ W
        w = jax.random.uniform(kw, (fan_in, fan_out), jnp.float32, -bound, bound)
        b = jax.random.uniform(kb, (1, fan_out), jnp.float32, -bound, bound)
        return w, b

    w1, b1 = linear(ks[0], ks[1], input_size, hidden_size)
    w2, b2 = linear(ks[2], ks[3], hidden_size, hidden_size)
    w3, b3 = linear(ks[4], ks[5], hidden_size, output_size)
    return (w1, b1, w2, b2, w3, b3)


def reference_forward(x, params, compute_dtype=jnp.float32):
    """Pure-JAX reference. compute_dtype=bf16 mirrors the kernel's casting path."""
    w1, b1, w2, b2, w3, b3 = params

    def lin(a, w, b):
        return jnp.dot(a.astype(compute_dtype), w.astype(compute_dtype),
                       preferred_element_type=jnp.float32) + b

    h = lin(x, w1, b1)
    h = jnp.maximum(h, 0.01 * h)
    h = jnp.tanh(lin(h, w2, b2))
    return lin(h, w3, b3)


if __name__ == "__main__":
    input_size, hidden_size, output_size = 16, 32, 8
    batch = 16

    key = jax.random.PRNGKey(0)
    kx, kp = jax.random.split(key)
    x = jax.random.normal(kx, (batch, input_size), jnp.float32)
    params = init_params(kp, input_size, hidden_size, output_size)

    # Weight pad + cast done ONCE, outside the per-call path.
    prepared = prepare_params(params, compute_dtype=jnp.bfloat16)

    out = neural_net_forward(x, prepared)
    out = jax.block_until_ready(out)

    assert out.shape == (batch, output_size)

    # Tight check vs. a reference that applies the same bf16 matmul casting.
    ref_bf16 = reference_forward(x, params, compute_dtype=jnp.bfloat16)
    assert jnp.allclose(out, ref_bf16, atol=1e-4, rtol=1e-4), \
        "mismatch vs bf16-matched reference"

    # Looser fidelity check vs. the pure-f32 PyTorch-equivalent math.
    ref_f32 = reference_forward(x, params, compute_dtype=jnp.float32)
    assert jnp.allclose(out, ref_f32, atol=3e-2, rtol=3e-2), \
        "mismatch vs f32 reference"

    print("KERNEL_OK")
</pallas_src>

<mosaic_0001>
module attributes {stable_mosaic.version = 11 : i64} {
  func.func @mlp_kernel(%arg0: i32, %arg1: memref<16x128xf32, #tpu.memory_space<vmem>>, %arg2: memref<128x128xbf16, #tpu.memory_space<vmem>>, %arg3: memref<1x128xf32, #tpu.memory_space<vmem>>, %arg4: memref<128x128xbf16, #tpu.memory_space<vmem>>, %arg5: memref<1x128xf32, #tpu.memory_space<vmem>>, %arg6: memref<128x128xbf16, #tpu.memory_space<vmem>>, %arg7: memref<1x128xf32, #tpu.memory_space<vmem>>, %arg8: memref<16x128xf32, #tpu.memory_space<vmem>>) attributes {dimension_semantics = [#tpu.dimension_semantics<parallel>], iteration_bounds = array<i64: 1>, scalar_prefetch = 0 : i64, scratch_operands = 0 : i64, tpu.core_type = #tpu.core_type<tc>, window_params = [{transform_indices = @transform_0, window_bounds = array<i64: 16, 128>}, {pipeline_mode = #tpu.pipeline_mode<synchronous>, transform_indices = @transform_1, window_bounds = array<i64: 128, 128>}, {pipeline_mode = #tpu.pipeline_mode<synchronous>, transform_indices = @transform_2, window_bounds = array<i64: 1, 128>}, {pipeline_mode = #tpu.pipeline_mode<synchronous>, transform_indices = @transform_3, window_bounds = array<i64: 128, 128>}, {pipeline_mode = #tpu.pipeline_mode<synchronous>, transform_indices = @transform_4, window_bounds = array<i64: 1, 128>}, {pipeline_mode = #tpu.pipeline_mode<synchronous>, transform_indices = @transform_5, window_bounds = array<i64: 128, 128>}, {pipeline_mode = #tpu.pipeline_mode<synchronous>, transform_indices = @transform_6, window_bounds = array<i64: 1, 128>}, {transform_indices = @transform_7, window_bounds = array<i64: 16, 128>}]} {
    %c0 = arith.constant 0 : index
    %c0_0 = arith.constant 0 : index
    %0 = vector.load %arg1[%c0, %c0_0] : memref<16x128xf32, #tpu.memory_space<vmem>>, vector<16x128xf32>
    %1 = arith.truncf %0 : vector<16x128xf32> to vector<16x128xbf16>
    %c0_1 = arith.constant 0 : index
    %c0_2 = arith.constant 0 : index
    %2 = vector.load %arg2[%c0_1, %c0_2] : memref<128x128xbf16, #tpu.memory_space<vmem>>, vector<128x128xbf16>
    %cst = arith.constant dense<0.000000e+00> : vector<16x128xf32>
    %3 = tpu.matmul %1, %2, %cst {dimension_numbers = #tpu.dot_dimension_numbers<[1], [0], [0], [1], [0, 0, 1, 1], [], []>} : vector<16x128xbf16>, vector<128x128xbf16>, vector<16x128xf32> -> vector<16x128xf32>
    %c0_3 = arith.constant 0 : index
    %c0_4 = arith.constant 0 : index
    %4 = vector.load %arg3[%c0_3, %c0_4] : memref<1x128xf32, #tpu.memory_space<vmem>>, vector<1x128xf32>
    %5 = vector.broadcast %4 : vector<1x128xf32> to vector<16x128xf32>
    %6 = arith.addf %3, %5 : vector<16x128xf32>
    %cst_5 = arith.constant 0.00999999977 : f32
    %7 = vector.broadcast %cst_5 : f32 to vector<16x128xf32>
    %8 = arith.mulf %7, %6 : vector<16x128xf32>
    %9 = arith.maximumf %6, %8 : vector<16x128xf32>
    %10 = arith.truncf %9 : vector<16x128xf32> to vector<16x128xbf16>
    %c0_6 = arith.constant 0 : index
    %c0_7 = arith.constant 0 : index
    %11 = vector.load %arg4[%c0_6, %c0_7] : memref<128x128xbf16, #tpu.memory_space<vmem>>, vector<128x128xbf16>
    %cst_8 = arith.constant dense<0.000000e+00> : vector<16x128xf32>
    %12 = tpu.matmul %10, %11, %cst_8 {dimension_numbers = #tpu.dot_dimension_numbers<[1], [0], [0], [1], [0, 0, 1, 1], [], []>} : vector<16x128xbf16>, vector<128x128xbf16>, vector<16x128xf32> -> vector<16x128xf32>
    %c0_9 = arith.constant 0 : index
    %c0_10 = arith.constant 0 : index
    %13 = vector.load %arg5[%c0_9, %c0_10] : memref<1x128xf32, #tpu.memory_space<vmem>>, vector<1x128xf32>
    %14 = vector.broadcast %13 : vector<1x128xf32> to vector<16x128xf32>
    %15 = arith.addf %12, %14 : vector<16x128xf32>
    %16 = math.tanh %15 : vector<16x128xf32>
    %17 = arith.truncf %16 : vector<16x128xf32> to vector<16x128xbf16>
    %c0_11 = arith.constant 0 : index
    %c0_12 = arith.constant 0 : index
    %18 = vector.load %arg6[%c0_11, %c0_12] : memref<128x128xbf16, #tpu.memory_space<vmem>>, vector<128x128xbf16>
    %cst_13 = arith.constant dense<0.000000e+00> : vector<16x128xf32>
    %19 = tpu.matmul %17, %18, %cst_13 {dimension_numbers = #tpu.dot_dimension_numbers<[1], [0], [0], [1], [0, 0, 1, 1], [], []>} : vector<16x128xbf16>, vector<128x128xbf16>, vector<16x128xf32> -> vector<16x128xf32>
    %c0_14 = arith.constant 0 : index
    %c0_15 = arith.constant 0 : index
    %20 = vector.load %arg7[%c0_14, %c0_15] : memref<1x128xf32, #tpu.memory_space<vmem>>, vector<1x128xf32>
    %21 = vector.broadcast %20 : vector<1x128xf32> to vector<16x128xf32>
    %22 = arith.addf %19, %21 : vector<16x128xf32>
    %c0_16 = arith.constant 0 : index
    %c0_17 = arith.constant 0 : index
    %23 = vector.load %arg8[%c0_16, %c0_17] : memref<16x128xf32, #tpu.memory_space<vmem>>, vector<16x128xf32>
    tpu.vector_store %arg8[%c0_16, %c0_17], %22 {strides = array<i32>} : memref<16x128xf32, #tpu.memory_space<vmem>>, vector<16x128xf32>,
    return
  }
  func.func @transform_0(%arg0: i32) -> (i32, i32) {
    %c0_i32 = arith.constant 0 : i32
    %c0_i32_0 = arith.constant 0 : i32
    return %arg0, %c0_i32 : i32, i32
  }
  func.func @transform_1(%arg0: i32) -> (i32, i32) {
    %c0_i32 = arith.constant 0 : i32
    %c0_i32_0 = arith.constant 0 : i32
    %c0_i32_1 = arith.constant 0 : i32
    return %c0_i32, %c0_i32_0 : i32, i32
  }
  func.func @transform_2(%arg0: i32) -> (i32, i32) {
    %c0_i32 = arith.constant 0 : i32
    %c0_i32_0 = arith.constant 0 : i32
    %c0_i32_1 = arith.constant 0 : i32
    return %c0_i32, %c0_i32_0 : i32, i32
  }
  func.func @transform_3(%arg0: i32) -> (i32, i32) {
    %c0_i32 = arith.constant 0 : i32
    %c0_i32_0 = arith.constant 0 : i32
    %c0_i32_1 = arith.constant 0 : i32
    return %c0_i32, %c0_i32_0 : i32, i32
  }
  func.func @transform_4(%arg0: i32) -> (i32, i32) {
    %c0_i32 = arith.constant 0 : i32
    %c0_i32_0 = arith.constant 0 : i32
    %c0_i32_1 = arith.constant 0 : i32
    return %c0_i32, %c0_i32_0 : i32, i32
  }
  func.func @transform_5(%arg0: i32) -> (i32, i32) {
    %c0_i32 = arith.constant 0 : i32
    %c0_i32_0 = arith.constant 0 : i32
    %c0_i32_1 = arith.constant 0 : i32
    return %c0_i32, %c0_i32_0 : i32, i32
  }
  func.func @transform_6(%arg0: i32) -> (i32, i32) {
    %c0_i32 = arith.constant 0 : i32
    %c0_i32_0 = arith.constant 0 : i32
    %c0_i32_1 = arith.constant 0 : i32
    return %c0_i32, %c0_i32_0 : i32, i32
  }
  func.func @transform_7(%arg0: i32) -> (i32, i32) {
    %c0_i32 = arith.constant 0 : i32
    %c0_i32_0 = arith.constant 0 : i32
    return %arg0, %c0_i32 : i32, i32
  }
}

</mosaic_0001>

<bundles_post_ra>
// kernel: tpu_custom_call.1
= control target key start
LH: loop header
LB: loop body
LE: loop exit
PB: predicated region body
PF: predicated region fallthrough
CT: control target
= control target key end

     0   :  { %12 = vsyncpa [#allocation3], 0  ;;  %s713_s0 = inlined_call_operand.hbm [shape: f32[16,128], index: 0, kind: input, shape index: {}]   ;;  %s714_s1 = inlined_call_operand.hbm [shape: bf16[128,128], index: 1, kind: input, shape index: {}]   ;;  %s715_s2 = inlined_call_operand.vmem [shape: f32[1,128], index: 2, kind: input, shape index: {}]   ;;  %s716_s3 = inlined_call_operand.hbm [shape: bf16[128,128], index: 3, kind: input, shape index: {}]   ;;  %s717_s4 = inlined_call_operand.vmem [shape: f32[1,128], index: 4, kind: input, shape index: {}]   ;;  %s718_s5 = inlined_call_operand.hbm [shape: bf16[128,128], index: 5, kind: input, shape index: {}]   ;;  %s719_s6 = inlined_call_operand.vmem [shape: f32[1,128], index: 6, kind: input, shape index: {}]   ;;  %s720_s7 = inlined_call_operand.hbm [shape: f32[16,128], index: 7, kind: output, shape index: {}]  }
   0x1   :  { %13 = vsyncpa [#allocation6], 0 }
   0x2   :  { %14 = vsyncpa [#allocation9], 0  ;;  %s33_s26 = sshll.u32 %s714_s1, 4  ;;  %s34_s26 = int_to_ptr.hbm [resolvable:$true] %s33_s26 }
   0x3   :  { %15 = vsyncpa [#allocation4], 0  ;;  %s634_s27 = smov [#allocation5]   ;;  %s20_s8 = sshll.u32 %s713_s0, 4  ;;  %s21_s8 = int_to_ptr.hbm [resolvable:$true] %s20_s8 }
   0x4   :  { %s35_s28 = sshll.u32 %s634_s27, 4  ;;  %s635_s9 = smov 64   ;;  %s36_s28 = int_to_ptr.vmem [resolvable:$true] %s35_s28 }
   0x5   :  { %s636_s10 = smov 4   ;;  %s637_s11 = smov [#allocation2]  }
   0x6   :  { %41 = dma.hbm_to_vmem [thread:$0]  %s34_s26, 1024, %s36_s28, [#allocation6], %s635_s9, %s635_s9, %s636_s10  }
   0x7   :  { %s22_s12 = sshll.u32 %s637_s11, 4  ;;  %s638_s13 = smov 128   ;;  %s23_s12 = int_to_ptr.vmem [resolvable:$true] %s22_s12 }
   0x8   :  { %s639_s14 = smov 8   ;;  %s48_s16 = sshll.u32 %s716_s3, 4  ;;  %s49_s16 = int_to_ptr.hbm [resolvable:$true] %s48_s16 }
   0x9   :  { %28 = dma.hbm_to_vmem [thread:$0]  %s21_s8, 256, %s23_s12, [#allocation3], %s638_s13, %s638_s13, %s639_s14  }
   0xa   :  { %s640_s17 = smov [#allocation7]   ;;  %s63_s20 = sshll.u32 %s718_s5, 4  ;;  %s64_s20 = int_to_ptr.hbm [resolvable:$true] %s63_s20 }
   0xb   :  { %s50_s0 = sshll.u32 %s640_s17, 4  ;;  %s641_s21 = smov [#allocation8]   ;;  %s51_s0 = int_to_ptr.vmem [resolvable:$true] %s50_s0 }
   0xc   :  { %56 = dma.hbm_to_vmem [thread:$0]  %s49_s16, 1024, %s51_s0, [#allocation6], %s635_s9, %s635_s9, %s636_s10  }
   0xd   :  { %s65_s22 = sshll.u32 %s641_s21, 4  ;;  %s66_s22 = int_to_ptr.vmem [resolvable:$true] %s65_s22 }
   0xe   :  { %71 = dma.hbm_to_vmem [thread:$0]  %s64_s20, 1024, %s66_s22, [#allocation9], %s635_s9, %s635_s9, %s636_s10  }
   0xf   :  { %626 = dma.done.wait [#allocation3], 256  }
  0x10   :  { %627 = vsyncadd [#allocation3], 4294967040 }
  0x11   :  { %628 = dma.done.wait [#allocation6], 2048  }
  0x12   :  { %629 = vsyncadd [#allocation6], 4294965248 }
  0x13   :  { %630 = dma.done.wait [#allocation9], 1024  }
  0x14   :  { %631 = vsyncadd [#allocation9], 4294966272  ;;  %v473_v0 = vld [vmem:[#allocation5 + $0x38] sm:$0xff]  ;;  %v472_v1 = vld [vmem:[#allocation5 + $0x30] sm:$0xff]  ;;  %s642_s26 = smov [#allocation10]   ;;  %s355_s29 = sshll.u32 %s720_s7, 4  ;;  %s356_s29 = int_to_ptr.hbm [resolvable:$true] %s355_s29 }
  0x15   :  { %161 = vmatpush.bf16.msra.mxu0 %v473_v0  ;;  %v481_v2 = vld [vmem:[#allocation7 + $0x38] sm:$0xff]  ;;  %v480_v3 = vld [vmem:[#allocation7 + $0x30] sm:$0xff]  ;;  %v471_v4 = vld [vmem:[#allocation5 + $0x28] sm:$0xff]  ;;  %s353_s27 = sshll.u32 %s642_s26, 4  ;;  %s354_s27 = int_to_ptr.vmem [resolvable:$true] %s353_s27 }
  0x16   :  { %248 = vmatpush.bf16.msra.mxu1 %v481_v2  ;;  %v479_v5 = vld [vmem:[#allocation7 + $0x28] sm:$0xff]  ;;  %v470_v6 = vld [vmem:[#allocation5 + $0x20] sm:$0xff]  ;;  %v469_v8 = vld [vmem:[#allocation5 + $0x18] sm:$0xff] }
  0x17   :  { %v478_v7 = vld [vmem:[#allocation7 + $0x20] sm:$0xff]  ;;  %v468_v9 = vld [vmem:[#allocation5 + $0x10] sm:$0xff]  ;;  %v467_v10 = vld [vmem:[#allocation5 + $0x8] sm:$0xff] }
  0x18   :  { %v466_v11 = vld [vmem:[#allocation5] sm:$0xff]  ;;  %v90_v12 = vld [vmem:[#allocation2] sm:$0xff]  ;;  %v91_v13 = vld [vmem:[#allocation2 + $0x8] sm:$0xff] }
  0x19   :  { %162 = vmatpush.bf16.msra.mxu0 %v472_v1  ;;  %v92_v14 = vpack.c.bf16 %v91_v13, %v90_v12  ;;  %v477_v15 = vld [vmem:[#allocation7 + $0x18] sm:$0xff]  ;;  %v476_v16 = vld [vmem:[#allocation7 + $0x10] sm:$0xff]  ;;  %v475_v17 = vld [vmem:[#allocation7 + $0x8] sm:$0xff] }
  0x1a   :  { %249 = vmatpush.bf16.msra.mxu1 %v480_v3  ;;  %v474_v18 = vld [vmem:[#allocation7] sm:$0xff]  ;;  %v489_v19 = vld [vmem:[#allocation8 + $0x38] sm:$0xff]  ;;  %v488_v20 = vld [vmem:[#allocation8 + $0x30] sm:$0xff] }
  0x1b   :  { %333 = vmatpush.bf16.msra.mxu2 %v489_v19  ;;  %v487_v21 = vld [vmem:[#allocation8 + $0x28] sm:$0xff]  ;;  %v499_v23 = vld [vmem:[%s715_s2] ss:$0 sm:$0xff]  ;;  %v486_v32 = vld [vmem:[#allocation8 + $0x20] sm:$0xff] }
  0x1c   :  { %v485_v33 = vld [vmem:[#allocation8 + $0x18] sm:$0xff]  ;;  %v484_v34 = vld [vmem:[#allocation8 + $0x10] sm:$0xff]  ;;  %v483_v35 = vld [vmem:[#allocation8 + $0x8] sm:$0xff] }
  0x1d   :  { %163 = vmatpush.bf16.msra.mxu0 %v471_v4  ;;  %v482_v36 = vld [vmem:[#allocation8] sm:$0xff]  ;;  %v500_v38 = vld [vmem:[%s717_s4] ss:$0 sm:$0xff] }
  0x1e   :  { %250 = vmatpush.bf16.msra.mxu1 %v479_v5  ;;  %v501_v45 = vld [vmem:[%s719_s6] ss:$0 sm:$0xff] }
  0x1f   :  { %334 = vmatpush.bf16.msra.mxu2 %v488_v20 }
  0x21   :  { %164 = vmatpush.bf16.msra.mxu0 %v470_v6 }
  0x22   :  { %251 = vmatpush.bf16.msra.mxu1 %v478_v7 }
  0x23   :  { %335 = vmatpush.bf16.msra.mxu2 %v487_v21 }
  0x25   :  { %165 = vmatpush.bf16.msra.mxu0 %v469_v8 }
  0x26   :  { %252 = vmatpush.bf16.msra.mxu1 %v477_v15 }
  0x27   :  { %336 = vmatpush.bf16.msra.mxu2 %v486_v32 }
  0x29   :  { %166 = vmatpush.bf16.msra.mxu0 %v468_v9 }
  0x2a   :  { %253 = vmatpush.bf16.msra.mxu1 %v476_v16 }
  0x2b   :  { %337 = vmatpush.bf16.msra.mxu2 %v485_v33 }
  0x2d   :  { %167 = vmatpush.bf16.msra.mxu0 %v467_v10 }
  0x2e   :  { %254 = vmatpush.bf16.msra.mxu1 %v475_v17 }
  0x2f   :  { %338 = vmatpush.bf16.msra.mxu2 %v484_v34 }
  0x31   :  { %168 = vmatpush.bf16.msra.mxu0 %v466_v11 }
  0x32   :  { %255 = vmatpush.bf16.msra.mxu1 %v474_v18 }
  0x33   :  { %339 = vmatpush.bf16.msra.mxu2 %v483_v35 }
  0x34   :  { %169 = vmatmul.bf16.vlgmr.msra.gmra.mxu0 %v92_v14 }
  0x37   :  { %340 = vmatpush.bf16.msra.mxu2 %v482_v36 }
  0xb1   :  { %v170_v22 = vpop.f32.mrf.mxu0 }
  0xb2   :  { %v171_v24 = vadd.f32 %v499_v23, %v170_v22 }
  0xb4   :  { %v175_v26 = vmul.f32 0.01, %v171_v24 }
  0xb6   :  { %v177_v29 = vmax.f32 %v171_v24, %v175_v26 }
  0xb9   :  { %v172_v25 = vpop.f32.mrf.mxu0 }
  0xba   :  { %v173_v27 = vadd.f32 %v499_v23, %v172_v25 }
  0xbc   :  { %v176_v28 = vmul.f32 0.01, %v173_v27 }
  0xbe   :  { %v178_v30 = vmax.f32 %v173_v27, %v176_v28 }
  0xc0   :  { %v179_v31 = vpack.c.bf16 %v178_v30, %v177_v29 }
  0xc2   :  { %256 = vmatmul.bf16.vlgmr.msra.gmra.mxu1 %v179_v31 }
 0x13f   :  { %v257_v37 = vpop.f32.mrf.mxu1 }
 0x140   :  { %v258_v39 = vadd.f32 %v500_v38, %v257_v37 }
 0x142   :  { %502 = vtanh.f32 %v258_v39 }
 0x147   :  { %v259_v40 = vpop.f32.mrf.mxu1 }
 0x148   :  { %v260_v41 = vadd.f32 %v500_v38, %v259_v40  ;;  %v503_v42 = vpop.eup %502 }
 0x14a   :  { %504 = vtanh.f32 %v260_v41 }
 0x150   :  { %v505_v43 = vpop.eup %504 }
 0x151   :  { %v264_v44 = vpack.c.bf16 %v505_v43, %v503_v42 }
 0x153   :  { %341 = vmatmul.bf16.vlgmr.msra.gmra.mxu2 %v264_v44 }
 0x1d6   :  { %v342_v46 = vpop.f32.mrf.mxu2 }
 0x1d7   :  { %v343_v47 = vadd.f32 %v501_v45, %v342_v46 }
 0x1d9   :  { %347 = vst [vmem:[#allocation10] sm:$0xff] %v343_v47 }
 0x1de   :  { %v344_v48 = vpop.f32.mrf.mxu2 }
 0x1df   :  { %v345_v49 = vadd.f32 %v501_v45, %v344_v48 }
 0x1e1   :  { %348 = vst [vmem:[#allocation10 + $0x8] sm:$0xff] %v345_v49 }
 0x1e2   :  { %361 = dma.vmem_to_hbm [thread:$0]  %s354_s27, 256, %s356_s29, [#allocation4], %s638_s13, %s638_s13, %s639_s14  }
 0x1e3   :  { %632 = dma.done.wait [#allocation4], 256  }
 0x1e4   :  { %633 = vsyncadd [#allocation4], 4294967040 }
 0x1e5   :  { %366 = vsyncpa [#allocation3], 1 }
 0x1e6   :  { %367 = vsyncpa [#allocation6], 1 }
 0x1e7   :  { %368 = vsyncpa [#allocation9], 1 }
 0x1e8   :  { %369 = vsyncpa [#allocation4], 1 }

</bundles_post_ra>
